<compile_context>
chip_gen: v6e
topology: v6e:2x2x1
jax: 0.10.0
libtpu: 0.0.40
codegen_flags: <defaults>
</compile_context>

<pallas_src>
import functools

import jax
import jax.numpy as jnp
from jax import lax
from jax.experimental import pallas as pl
from jax.experimental.pallas import tpu as pltpu


def _attention_kernel(x_ref, wqkv_ref, bqkv_ref, wproj_ref, bproj_ref, o_ref,
                      qkv_s, acc_s, *, num_heads, head_dim, q_tile, embed_dim):
    """Grid = (batch, query-tile).

    x_ref:     (1, N, C)   full-sequence input (compute dtype), reused across q-tiles
    wqkv_ref:  (C, 3C)     [Wq^T*scale | Wk^T | Wv^T] (pre-transposed on host)
    bqkv_ref:  (1, 3C)     [bq*scale | bk | bv], f32
    wproj_ref: (H, hd, C)  per-head rows of W_proj^T
    bproj_ref: (1, C)      proj bias, f32
    o_ref:     (1, TQ, C)  output tile
    qkv_s:     (N, 3C)     VMEM scratch with Q|K|V, carried across the q-tile axis
    acc_s:     (TQ, C) f32 VMEM accumulator for the head-summed projection
    """
    qi = pl.program_id(1)
    hd = head_dim
    C = embed_dim
    N = x_ref.shape[1]

    # ---- once per batch element: fused, lane-dense QKV projection (row-chunked
    #      so the f32 temporary stays bounded to (TQ, 3C)) ----
    @pl.when(qi == 0)
    def _():
        n_chunks = N // q_tile

        @pl.loop(0, n_chunks)
        def _(r):
            r0 = pl.multiple_of(r * q_tile, q_tile)
            xr = x_ref[0, pl.ds(r0, q_tile), :]                       # (TQ, C)
            qkv_r = jnp.dot(xr, wqkv_ref[...],                        # (TQ, 3C), f32 acc
                            preferred_element_type=jnp.float32)
            qkv_r = qkv_r + bqkv_ref[...]
            qkv_s[pl.ds(r0, q_tile), :] = qkv_r.astype(qkv_s.dtype)

    # ---- per query tile: attention + output projection, head by head ----
    q_start = pl.multiple_of(qi * q_tile, q_tile)

    # Initialize the accumulator with the (broadcast) projection bias.
    acc_s[...] = jnp.zeros_like(acc_s) + bproj_ref[...]

    # Static head loop: static lane slices into the 2-D scratch; each iteration ends
    # in a ref store, so the (TQ, N) scores are not live across heads.
    for h in range(num_heads):
        q = qkv_s[pl.ds(q_start, q_tile), h * hd:(h + 1) * hd]        # (TQ, hd); scale folded in
        k = qkv_s[:, C + h * hd:C + (h + 1) * hd]                     # (N, hd)
        v = qkv_s[:, 2 * C + h * hd:2 * C + (h + 1) * hd]             # (N, hd)

        # Scores via trans-B contraction on the MXU (no in-kernel transpose).
        s = lax.dot_general(q, k, (((1,), (1,)), ((), ())),
                            preferred_element_type=jnp.float32)       # (TQ, N)
        m = jnp.max(s, axis=-1, keepdims=True)
        p = jnp.exp(s - m)                                            # EUP
        l = jnp.sum(p, axis=-1, keepdims=True)
        pv = jnp.dot(p.astype(v.dtype), v,
                     preferred_element_type=jnp.float32)              # (TQ, hd)
        out_h = pv * pl.reciprocal(l, approx=True)                    # normalize after P@V

        # Output projection decomposed over heads: lane-dense (TQ, C) accumulate.
        acc_s[...] += jnp.dot(out_h.astype(wproj_ref.dtype), wproj_ref[h],
                              preferred_element_type=jnp.float32)

    o_ref[0] = acc_s[...].astype(o_ref.dtype)


def attention_pallas(x, w_qkv, b_qkv, w_proj, b_proj, num_heads, *,
                     compute_dtype=None, q_tile=None):
    B, N, C = x.shape
    assert C % num_heads == 0, "embed_dim must be divisible by num_heads"
    hd = C // num_heads
    scale = float(hd ** (-0.5))
    cd = jnp.dtype(compute_dtype) if compute_dtype is not None else x.dtype
    out_dtype = x.dtype

    # ---- host-side layout plumbing (free): pre-transpose, fold softmax scale into
    #      the Q projection; per-head regroup of the output projection ----
    col_scale = jnp.concatenate([jnp.full((C,), scale, jnp.float32),
                                 jnp.ones((2 * C,), jnp.float32)])
    w_all = (w_qkv.T.astype(jnp.float32) * col_scale[None, :]).astype(cd)  # (C, 3C)
    b_all = (b_qkv.astype(jnp.float32) * col_scale).reshape(1, 3 * C)      # (1, 3C) f32

    wproj_heads = w_proj.T.reshape(num_heads, hd, C).astype(cd)            # (H, hd, C)
    b_proj2 = b_proj.reshape(1, C).astype(jnp.float32)

    x_c = x.astype(cd)

    # Query tiling bounds the per-head score matrix to (q_tile, N) and gives the
    # output pipeline lane-dense (1, TQ, C) blocks.
    if q_tile is None:
        q_tile = 128 if (N % 128 == 0 and N > 128) else N
    assert N % q_tile == 0
    num_q_tiles = N // q_tile

    kernel = functools.partial(_attention_kernel, num_heads=num_heads,
                               head_dim=hd, q_tile=q_tile, embed_dim=C)

    return pl.pallas_call(
        kernel,
        out_shape=jax.ShapeDtypeStruct((B, N, C), out_dtype),
        grid_spec=pltpu.PrefetchScalarGridSpec(
            num_scalar_prefetch=0,
            grid=(B, num_q_tiles),
            in_specs=[
                pl.BlockSpec((1, N, C), lambda b, qi: (b, 0, 0)),           # x (full seq, reused over qi)
                pl.BlockSpec((C, 3 * C), lambda b, qi: (0, 0)),             # fused QKV weight
                pl.BlockSpec((1, 3 * C), lambda b, qi: (0, 0)),             # fused QKV bias
                pl.BlockSpec((num_heads, hd, C), lambda b, qi: (0, 0, 0)),  # per-head proj weight
                pl.BlockSpec((1, C), lambda b, qi: (0, 0)),                 # proj bias
            ],
            out_specs=pl.BlockSpec((1, q_tile, C), lambda b, qi: (b, qi, 0)),
            scratch_shapes=[
                pltpu.VMEM((N, 3 * C), cd),                  # Q|K|V, carried across qi
                pltpu.VMEM((q_tile, C), jnp.float32),        # projection accumulator
            ],
        ),
        compiler_params=pltpu.CompilerParams(
            dimension_semantics=("parallel", "arbitrary"),   # batch across cores; qi carries scratch
            vmem_limit_bytes=64 * 1024 * 1024,
        ),
    )(x_c, w_all, b_all, wproj_heads, b_proj2)


def attention_reference(x, w_qkv, b_qkv, w_proj, b_proj, num_heads):
    """Pure-JAX reference mirroring the PyTorch forward exactly."""
    B, N, C = x.shape
    hd = C // num_heads
    scale = (C // num_heads) ** (-0.5)
    qkv = x @ w_qkv.T + b_qkv                               # (B, N, 3C)
    qkv = qkv.reshape(B, N, 3, num_heads, hd).transpose(2, 0, 3, 1, 4)
    q, k, v = qkv[0], qkv[1], qkv[2]                        # (B, H, N, hd)
    attn = jnp.einsum("bhnd,bhmd->bhnm", q, k) * scale
    attn = jax.nn.softmax(attn, axis=-1)
    y = jnp.einsum("bhnm,bhmd->bhnd", attn, v)              # (B, H, N, hd)
    y = y.transpose(0, 2, 1, 3).reshape(B, N, C)
    return y @ w_proj.T + b_proj


if __name__ == "__main__":
    # Small, ViT-consistent shapes: batch=2, seq=8, embed_dim=32, heads=4 (head_dim=8)
    B, N, C, H = 2, 8, 32, 4

    key = jax.random.PRNGKey(0)
    kx, kw1, kb1, kw2, kb2 = jax.random.split(key, 5)
    x = jax.random.normal(kx, (B, N, C), dtype=jnp.float32)
    w_qkv = jax.random.normal(kw1, (3 * C, C), dtype=jnp.float32) * (1.0 / jnp.sqrt(C))
    b_qkv = jax.random.normal(kb1, (3 * C,), dtype=jnp.float32) * 0.02
    w_proj = jax.random.normal(kw2, (C, C), dtype=jnp.float32) * (1.0 / jnp.sqrt(C))
    b_proj = jax.random.normal(kb2, (C,), dtype=jnp.float32) * 0.02

    ref = attention_reference(x, w_qkv, b_qkv, w_proj, b_proj, H)

    # f32 path (approx-reciprocal softmax denom -> slightly loosened tolerance).
    out = jax.block_until_ready(attention_pallas(x, w_qkv, b_qkv, w_proj, b_proj, H))
    assert out.shape == (B, N, C)
    assert jnp.allclose(out, ref, atol=2e-2, rtol=2e-2), "f32 mismatch vs reference"

    # bf16 MXU-input path (f32 accumulation / f32 softmax stats).
    out_bf = jax.block_until_ready(
        attention_pallas(x, w_qkv, b_qkv, w_proj, b_proj, H, compute_dtype=jnp.bfloat16))
    assert jnp.allclose(out_bf.astype(jnp.float32), ref, atol=1e-1, rtol=1e-1), "bf16 mismatch"

    # Multi-query-tile path (exercises the carried QKV scratch and the row-chunked
    # projection loop): N=256 -> two 128-row tiles.
    B2, N2, C2, H2 = 2, 256, 128, 4
    k2 = jax.random.split(jax.random.PRNGKey(1), 5)
    x2 = jax.random.normal(k2[0], (B2, N2, C2), dtype=jnp.float32)
    w_qkv2 = jax.random.normal(k2[1], (3 * C2, C2), dtype=jnp.float32) * (1.0 / jnp.sqrt(C2))
    b_qkv2 = jax.random.normal(k2[2], (3 * C2,), dtype=jnp.float32) * 0.02
    w_proj2 = jax.random.normal(k2[3], (C2, C2), dtype=jnp.float32) * (1.0 / jnp.sqrt(C2))
    b_proj2 = jax.random.normal(k2[4], (C2,), dtype=jnp.float32) * 0.02
    out2 = jax.block_until_ready(
        attention_pallas(x2, w_qkv2, b_qkv2, w_proj2, b_proj2, H2))
    ref2 = attention_reference(x2, w_qkv2, b_qkv2, w_proj2, b_proj2, H2)
    assert jnp.allclose(out2, ref2, atol=2e-2, rtol=2e-2), "multi-tile mismatch vs reference"

    print("KERNEL_OK")
</pallas_src>

<mosaic_0001>
module attributes {stable_mosaic.version = 11 : i64} {
  func.func @_attention_kernel(%arg0: i32, %arg1: i32, %arg2: memref<1x8x32xf32, #tpu.memory_space<vmem>>, %arg3: memref<32x96xf32, #tpu.memory_space<vmem>>, %arg4: memref<1x96xf32, #tpu.memory_space<vmem>>, %arg5: memref<4x8x32xf32, #tpu.memory_space<vmem>>, %arg6: memref<1x32xf32, #tpu.memory_space<vmem>>, %arg7: memref<1x8x32xf32, #tpu.memory_space<vmem>>, %arg8: memref<8x96xf32, #tpu.memory_space<vmem>>, %arg9: memref<8x32xf32, #tpu.memory_space<vmem>>) attributes {dimension_semantics = [#tpu.dimension_semantics<parallel>, #tpu.dimension_semantics<arbitrary>], iteration_bounds = array<i64: 2, 1>, scalar_prefetch = 0 : i64, scratch_operands = 2 : i64, tpu.core_type = #tpu.core_type<tc>, window_params = [{transform_indices = @transform_0, window_bounds = array<i64: 1, 8, 32>}, {pipeline_mode = #tpu.pipeline_mode<synchronous>, transform_indices = @transform_1, window_bounds = array<i64: 32, 96>}, {pipeline_mode = #tpu.pipeline_mode<synchronous>, transform_indices = @transform_2, window_bounds = array<i64: 1, 96>}, {pipeline_mode = #tpu.pipeline_mode<synchronous>, transform_indices = @transform_3, window_bounds = array<i64: 4, 8, 32>}, {pipeline_mode = #tpu.pipeline_mode<synchronous>, transform_indices = @transform_4, window_bounds = array<i64: 1, 32>}, {transform_indices = @transform_5, window_bounds = array<i64: 1, 8, 32>}]} {
    %c0_i32 = arith.constant 0 : i32
    %0 = arith.cmpi eq, %arg1, %c0_i32 : i32
    %1 = arith.extui %0 : i1 to i32
    %c0_i32_0 = arith.constant 0 : i32
    %2 = arith.cmpi ne, %1, %c0_i32_0 : i32
    scf.if %2 {
      %c0_i32_63 = arith.constant 0 : i32
      %c1_i32 = arith.constant 1 : i32
      %102 = arith.muli %c0_i32_63, %c1_i32 : i32
      %c0_i32_64 = arith.constant 0 : i32
      %103 = arith.addi %c0_i32_64, %102 : i32
      %c8_i32_65 = arith.constant 8 : i32
      %104 = arith.muli %103, %c8_i32_65 : i32
      %105 = tpu.assume_multiple %104, 8 : i32
      %c0_66 = arith.constant 0 : index
      %106 = arith.index_cast %105 : i32 to index
      %c0_67 = arith.constant 0 : index
      %107 = vector.load %arg2[%c0_66, %106, %c0_67] : memref<1x8x32xf32, #tpu.memory_space<vmem>>, vector<1x8x32xf32>
      %108 = vector.shape_cast %107 : vector<1x8x32xf32> to vector<8x32xf32>
      %c0_68 = arith.constant 0 : index
      %c0_69 = arith.constant 0 : index
      %109 = vector.load %arg3[%c0_68, %c0_69] : memref<32x96xf32, #tpu.memory_space<vmem>>, vector<32x96xf32>
      %cst_70 = arith.constant dense<0.000000e+00> : vector<8x96xf32>
      %110 = tpu.matmul %108, %109, %cst_70 {dimension_numbers = #tpu.dot_dimension_numbers<[1], [0], [0], [1], [0, 0, 1, 1], [], []>} : vector<8x32xf32>, vector<32x96xf32>, vector<8x96xf32> -> vector<8x96xf32>
      %c0_71 = arith.constant 0 : index
      %c0_72 = arith.constant 0 : index
      %111 = vector.load %arg4[%c0_71, %c0_72] : memref<1x96xf32, #tpu.memory_space<vmem>>, vector<1x96xf32>
      %112 = vector.broadcast %111 : vector<1x96xf32> to vector<8x96xf32>
      %113 = arith.addf %110, %112 : vector<8x96xf32>
      %114 = arith.index_cast %105 : i32 to index
      %c0_73 = arith.constant 0 : index
      %115 = vector.load %arg8[%114, %c0_73] : memref<8x96xf32, #tpu.memory_space<vmem>>, vector<8x96xf32>
      tpu.vector_store %arg8[%114, %c0_73], %113 {strides = array<i32>} : memref<8x96xf32, #tpu.memory_space<vmem>>, vector<8x96xf32>,
      %c1_i32_74 = arith.constant 1 : i32
    } else {
    }
    %c8_i32 = arith.constant 8 : i32
    %3 = arith.muli %arg1, %c8_i32 : i32
    %4 = tpu.assume_multiple %3, 8 : i32
    %cst = arith.constant 0.000000e+00 : f32
    %5 = vector.broadcast %cst : f32 to vector<8x32xf32>
    %c0 = arith.constant 0 : index
    %c0_1 = arith.constant 0 : index
    %6 = vector.load %arg6[%c0, %c0_1] : memref<1x32xf32, #tpu.memory_space<vmem>>, vector<1x32xf32>
    %7 = vector.broadcast %6 : vector<1x32xf32> to vector<8x32xf32>
    %8 = arith.addf %5, %7 : vector<8x32xf32>
    %c0_2 = arith.constant 0 : index
    %c0_3 = arith.constant 0 : index
    %9 = vector.load %arg9[%c0_2, %c0_3] : memref<8x32xf32, #tpu.memory_space<vmem>>, vector<8x32xf32>
    tpu.vector_store %arg9[%c0_2, %c0_3], %8 {strides = array<i32>} : memref<8x32xf32, #tpu.memory_space<vmem>>, vector<8x32xf32>,
    %10 = arith.index_cast %4 : i32 to index
    %c0_4 = arith.constant 0 : index
    %11 = vector.load %arg8[%10, %c0_4] : memref<8x96xf32, #tpu.memory_space<vmem>>, vector<8x8xf32>
    %c0_5 = arith.constant 0 : index
    %c32 = arith.constant 32 : index
    %12 = vector.load %arg8[%c0_5, %c32] : memref<8x96xf32, #tpu.memory_space<vmem>>, vector<8x8xf32>
    %c0_6 = arith.constant 0 : index
    %c64 = arith.constant 64 : index
    %13 = vector.load %arg8[%c0_6, %c64] : memref<8x96xf32, #tpu.memory_space<vmem>>, vector<8x8xf32>
    %cst_7 = arith.constant dense<0.000000e+00> : vector<8x8xf32>
    %14 = tpu.matmul %11, %12, %cst_7 {dimension_numbers = #tpu.dot_dimension_numbers<[1], [1], [0], [0], [0, 0, 1, 0], [], []>} : vector<8x8xf32>, vector<8x8xf32>, vector<8x8xf32> -> vector<8x8xf32>
    %cst_8 = arith.constant dense<0xFF800000> : vector<8xf32>
    %15 = vector.multi_reduction <maximumf>, %14, %cst_8 [1] : vector<8x8xf32> to vector<8xf32>
    %16 = vector.shape_cast %15 : vector<8xf32> to vector<8x1xf32>
    %17 = vector.broadcast %16 : vector<8x1xf32> to vector<8x8xf32>
    %18 = arith.subf %14, %17 : vector<8x8xf32>
    %19 = math.exp %18 : vector<8x8xf32>
    %cst_9 = arith.constant dense<0.000000e+00> : vector<8xf32>
    %20 = vector.multi_reduction <add>, %19, %cst_9 [1] : vector<8x8xf32> to vector<8xf32>
    %21 = vector.shape_cast %20 : vector<8xf32> to vector<8x1xf32>
    %cst_10 = arith.constant dense<0.000000e+00> : vector<8x8xf32>
    %22 = tpu.matmul %19, %13, %cst_10 {dimension_numbers = #tpu.dot_dimension_numbers<[1], [0], [0], [1], [0, 0, 1, 1], [], []>} : vector<8x8xf32>, vector<8x8xf32>, vector<8x8xf32> -> vector<8x8xf32>
    %23 = tpu.reciprocal %21 {approx = true} : vector<8x1xf32> -> vector<8x1xf32>
    %24 = vector.broadcast %23 : vector<8x1xf32> to vector<8x8xf32>
    %25 = arith.mulf %22, %24 : vector<8x8xf32>
    %c0_11 = arith.constant 0 : index
    %c0_12 = arith.constant 0 : index
    %26 = vector.load %arg9[%c0_11, %c0_12] : memref<8x32xf32, #tpu.memory_space<vmem>>, vector<8x32xf32>
    %c0_13 = arith.constant 0 : index
    %c0_14 = arith.constant 0 : index
    %c0_15 = arith.constant 0 : index
    %27 = vector.load %arg5[%c0_13, %c0_14, %c0_15] : memref<4x8x32xf32, #tpu.memory_space<vmem>>, vector<1x8x32xf32>
    %28 = vector.shape_cast %27 : vector<1x8x32xf32> to vector<8x32xf32>
    %cst_16 = arith.constant dense<0.000000e+00> : vector<8x32xf32>
    %29 = tpu.matmul %25, %28, %cst_16 {dimension_numbers = #tpu.dot_dimension_numbers<[1], [0], [0], [1], [0, 0, 1, 1], [], []>} : vector<8x8xf32>, vector<8x32xf32>, vector<8x32xf32> -> vector<8x32xf32>
    %30 = arith.addf %26, %29 : vector<8x32xf32>
    %c0_17 = arith.constant 0 : index
    %c0_18 = arith.constant 0 : index
    %31 = vector.load %arg9[%c0_17, %c0_18] : memref<8x32xf32, #tpu.memory_space<vmem>>, vector<8x32xf32>
    tpu.vector_store %arg9[%c0_17, %c0_18], %30 {strides = array<i32>} : memref<8x32xf32, #tpu.memory_space<vmem>>, vector<8x32xf32>,
    %32 = arith.index_cast %4 : i32 to index
    %c8 = arith.constant 8 : index
    %33 = vector.load %arg8[%32, %c8] : memref<8x96xf32, #tpu.memory_space<vmem>>, vector<8x8xf32>
    %c0_19 = arith.constant 0 : index
    %c40 = arith.constant 40 : index
    %34 = vector.load %arg8[%c0_19, %c40] : memref<8x96xf32, #tpu.memory_space<vmem>>, vector<8x8xf32>
    %c0_20 = arith.constant 0 : index
    %c72 = arith.constant 72 : index
    %35 = vector.load %arg8[%c0_20, %c72] : memref<8x96xf32, #tpu.memory_space<vmem>>, vector<8x8xf32>
    %cst_21 = arith.constant dense<0.000000e+00> : vector<8x8xf32>
    %36 = tpu.matmul %33, %34, %cst_21 {dimension_numbers = #tpu.dot_dimension_numbers<[1], [1], [0], [0], [0, 0, 1, 0], [], []>} : vector<8x8xf32>, vector<8x8xf32>, vector<8x8xf32> -> vector<8x8xf32>
    %cst_22 = arith.constant dense<0xFF800000> : vector<8xf32>
    %37 = vector.multi_reduction <maximumf>, %36, %cst_22 [1] : vector<8x8xf32> to vector<8xf32>
    %38 = vector.shape_cast %37 : vector<8xf32> to vector<8x1xf32>
    %39 = vector.broadcast %38 : vector<8x1xf32> to vector<8x8xf32>
    %40 = arith.subf %36, %39 : vector<8x8xf32>
    %41 = math.exp %40 : vector<8x8xf32>
    %cst_23 = arith.constant dense<0.000000e+00> : vector<8xf32>
    %42 = vector.multi_reduction <add>, %41, %cst_23 [1] : vector<8x8xf32> to vector<8xf32>
    %43 = vector.shape_cast %42 : vector<8xf32> to vector<8x1xf32>
    %cst_24 = arith.constant dense<0.000000e+00> : vector<8x8xf32>
    %44 = tpu.matmul %41, %35, %cst_24 {dimension_numbers = #tpu.dot_dimension_numbers<[1], [0], [0], [1], [0, 0, 1, 1], [], []>} : vector<8x8xf32>, vector<8x8xf32>, vector<8x8xf32> -> vector<8x8xf32>
    %45 = tpu.reciprocal %43 {approx = true} : vector<8x1xf32> -> vector<8x1xf32>
    %46 = vector.broadcast %45 : vector<8x1xf32> to vector<8x8xf32>
    %47 = arith.mulf %44, %46 : vector<8x8xf32>
    %c0_25 = arith.constant 0 : index
    %c0_26 = arith.constant 0 : index
    %48 = vector.load %arg9[%c0_25, %c0_26] : memref<8x32xf32, #tpu.memory_space<vmem>>, vector<8x32xf32>
    %c1 = arith.constant 1 : index
    %c0_27 = arith.constant 0 : index
    %c0_28 = arith.constant 0 : index
    %49 = vector.load %arg5[%c1, %c0_27, %c0_28] : memref<4x8x32xf32, #tpu.memory_space<vmem>>, vector<1x8x32xf32>
    %50 = vector.shape_cast %49 : vector<1x8x32xf32> to vector<8x32xf32>
    %cst_29 = arith.constant dense<0.000000e+00> : vector<8x32xf32>
    %51 = tpu.matmul %47, %50, %cst_29 {dimension_numbers = #tpu.dot_dimension_numbers<[1], [0], [0], [1], [0, 0, 1, 1], [], []>} : vector<8x8xf32>, vector<8x32xf32>, vector<8x32xf32> -> vector<8x32xf32>
    %52 = arith.addf %48, %51 : vector<8x32xf32>
    %c0_30 = arith.constant 0 : index
    %c0_31 = arith.constant 0 : index
    %53 = vector.load %arg9[%c0_30, %c0_31] : memref<8x32xf32, #tpu.memory_space<vmem>>, vector<8x32xf32>
    tpu.vector_store %arg9[%c0_30, %c0_31], %52 {strides = array<i32>} : memref<8x32xf32, #tpu.memory_space<vmem>>, vector<8x32xf32>,
    %54 = arith.index_cast %4 : i32 to index
    %c16 = arith.constant 16 : index
    %55 = vector.load %arg8[%54, %c16] : memref<8x96xf32, #tpu.memory_space<vmem>>, vector<8x8xf32>
    %c0_32 = arith.constant 0 : index
    %c48 = arith.constant 48 : index
    %56 = vector.load %arg8[%c0_32, %c48] : memref<8x96xf32, #tpu.memory_space<vmem>>, vector<8x8xf32>
    %c0_33 = arith.constant 0 : index
    %c80 = arith.constant 80 : index
    %57 = vector.load %arg8[%c0_33, %c80] : memref<8x96xf32, #tpu.memory_space<vmem>>, vector<8x8xf32>
    %cst_34 = arith.constant dense<0.000000e+00> : vector<8x8xf32>
    %58 = tpu.matmul %55, %56, %cst_34 {dimension_numbers = #tpu.dot_dimension_numbers<[1], [1], [0], [0], [0, 0, 1, 0], [], []>} : vector<8x8xf32>, vector<8x8xf32>, vector<8x8xf32> -> vector<8x8xf32>
    %cst_35 = arith.constant dense<0xFF800000> : vector<8xf32>
    %59 = vector.multi_reduction <maximumf>, %58, %cst_35 [1] : vector<8x8xf32> to vector<8xf32>
    %60 = vector.shape_cast %59 : vector<8xf32> to vector<8x1xf32>
    %61 = vector.broadcast %60 : vector<8x1xf32> to vector<8x8xf32>
    %62 = arith.subf %58, %61 : vector<8x8xf32>
    %63 = math.exp %62 : vector<8x8xf32>
    %cst_36 = arith.constant dense<0.000000e+00> : vector<8xf32>
    %64 = vector.multi_reduction <add>, %63, %cst_36 [1] : vector<8x8xf32> to vector<8xf32>
    %65 = vector.shape_cast %64 : vector<8xf32> to vector<8x1xf32>
    %cst_37 = arith.constant dense<0.000000e+00> : vector<8x8xf32>
    %66 = tpu.matmul %63, %57, %cst_37 {dimension_numbers = #tpu.dot_dimension_numbers<[1], [0], [0], [1], [0, 0, 1, 1], [], []>} : vector<8x8xf32>, vector<8x8xf32>, vector<8x8xf32> -> vector<8x8xf32>
    %67 = tpu.reciprocal %65 {approx = true} : vector<8x1xf32> -> vector<8x1xf32>
    %68 = vector.broadcast %67 : vector<8x1xf32> to vector<8x8xf32>
    %69 = arith.mulf %66, %68 : vector<8x8xf32>
    %c0_38 = arith.constant 0 : index
    %c0_39 = arith.constant 0 : index
    %70 = vector.load %arg9[%c0_38, %c0_39] : memref<8x32xf32, #tpu.memory_space<vmem>>, vector<8x32xf32>
    %c2 = arith.constant 2 : index
    %c0_40 = arith.constant 0 : index
    %c0_41 = arith.constant 0 : index
    %71 = vector.load %arg5[%c2, %c0_40, %c0_41] : memref<4x8x32xf32, #tpu.memory_space<vmem>>, vector<1x8x32xf32>
    %72 = vector.shape_cast %71 : vector<1x8x32xf32> to vector<8x32xf32>
    %cst_42 = arith.constant dense<0.000000e+00> : vector<8x32xf32>
    %73 = tpu.matmul %69, %72, %cst_42 {dimension_numbers = #tpu.dot_dimension_numbers<[1], [0], [0], [1], [0, 0, 1, 1], [], []>} : vector<8x8xf32>, vector<8x32xf32>, vector<8x32xf32> -> vector<8x32xf32>
    %74 = arith.addf %70, %73 : vector<8x32xf32>
    %c0_43 = arith.constant 0 : index
    %c0_44 = arith.constant 0 : index
    %75 = vector.load %arg9[%c0_43, %c0_44] : memref<8x32xf32, #tpu.memory_space<vmem>>, vector<8x32xf32>
    tpu.vector_store %arg9[%c0_43, %c0_44], %74 {strides = array<i32>} : memref<8x32xf32, #tpu.memory_space<vmem>>, vector<8x32xf32>,
    %76 = arith.index_cast %4 : i32 to index
    %c24 = arith.constant 24 : index
    %77 = vector.load %arg8[%76, %c24] : memref<8x96xf32, #tpu.memory_space<vmem>>, vector<8x8xf32>
    %c0_45 = arith.constant 0 : index
    %c56 = arith.constant 56 : index
    %78 = vector.load %arg8[%c0_45, %c56] : memref<8x96xf32, #tpu.memory_space<vmem>>, vector<8x8xf32>
    %c0_46 = arith.constant 0 : index
    %c88 = arith.constant 88 : index
    %79 = vector.load %arg8[%c0_46, %c88] : memref<8x96xf32, #tpu.memory_space<vmem>>, vector<8x8xf32>
    %cst_47 = arith.constant dense<0.000000e+00> : vector<8x8xf32>
    %80 = tpu.matmul %77, %78, %cst_47 {dimension_numbers = #tpu.dot_dimension_numbers<[1], [1], [0], [0], [0, 0, 1, 0], [], []>} : vector<8x8xf32>, vector<8x8xf32>, vector<8x8xf32> -> vector<8x8xf32>
    %cst_48 = arith.constant dense<0xFF800000> : vector<8xf32>
    %81 = vector.multi_reduction <maximumf>, %80, %cst_48 [1] : vector<8x8xf32> to vector<8xf32>
    %82 = vector.shape_cast %81 : vector<8xf32> to vector<8x1xf32>
    %83 = vector.broadcast %82 : vector<8x1xf32> to vector<8x8xf32>
    %84 = arith.subf %80, %83 : vector<8x8xf32>
    %85 = math.exp %84 : vector<8x8xf32>
    %cst_49 = arith.constant dense<0.000000e+00> : vector<8xf32>
    %86 = vector.multi_reduction <add>, %85, %cst_49 [1] : vector<8x8xf32> to vector<8xf32>
    %87 = vector.shape_cast %86 : vector<8xf32> to vector<8x1xf32>
    %cst_50 = arith.constant dense<0.000000e+00> : vector<8x8xf32>
    %88 = tpu.matmul %85, %79, %cst_50 {dimension_numbers = #tpu.dot_dimension_numbers<[1], [0], [0], [1], [0, 0, 1, 1], [], []>} : vector<8x8xf32>, vector<8x8xf32>, vector<8x8xf32> -> vector<8x8xf32>
    %89 = tpu.reciprocal %87 {approx = true} : vector<8x1xf32> -> vector<8x1xf32>
    %90 = vector.broadcast %89 : vector<8x1xf32> to vector<8x8xf32>
    %91 = arith.mulf %88, %90 : vector<8x8xf32>
    %c0_51 = arith.constant 0 : index
    %c0_52 = arith.constant 0 : index
    %92 = vector.load %arg9[%c0_51, %c0_52] : memref<8x32xf32, #tpu.memory_space<vmem>>, vector<8x32xf32>
    %c3 = arith.constant 3 : index
    %c0_53 = arith.constant 0 : index
    %c0_54 = arith.constant 0 : index
    %93 = vector.load %arg5[%c3, %c0_53, %c0_54] : memref<4x8x32xf32, #tpu.memory_space<vmem>>, vector<1x8x32xf32>
    %94 = vector.shape_cast %93 : vector<1x8x32xf32> to vector<8x32xf32>
    %cst_55 = arith.constant dense<0.000000e+00> : vector<8x32xf32>
    %95 = tpu.matmul %91, %94, %cst_55 {dimension_numbers = #tpu.dot_dimension_numbers<[1], [0], [0], [1], [0, 0, 1, 1], [], []>} : vector<8x8xf32>, vector<8x32xf32>, vector<8x32xf32> -> vector<8x32xf32>
    %96 = arith.addf %92, %95 : vector<8x32xf32>
    %c0_56 = arith.constant 0 : index
    %c0_57 = arith.constant 0 : index
    %97 = vector.load %arg9[%c0_56, %c0_57] : memref<8x32xf32, #tpu.memory_space<vmem>>, vector<8x32xf32>
    tpu.vector_store %arg9[%c0_56, %c0_57], %96 {strides = array<i32>} : memref<8x32xf32, #tpu.memory_space<vmem>>, vector<8x32xf32>,
    %c0_58 = arith.constant 0 : index
    %c0_59 = arith.constant 0 : index
    %98 = vector.load %arg9[%c0_58, %c0_59] : memref<8x32xf32, #tpu.memory_space<vmem>>, vector<8x32xf32>
    %c0_60 = arith.constant 0 : index
    %c0_61 = arith.constant 0 : index
    %c0_62 = arith.constant 0 : index
    %99 = vector.load %arg7[%c0_60, %c0_61, %c0_62] : memref<1x8x32xf32, #tpu.memory_space<vmem>>, vector<1x8x32xf32>
    %100 = vector.shape_cast %99 : vector<1x8x32xf32> to vector<8x32xf32>
    %101 = vector.shape_cast %98 : vector<8x32xf32> to vector<1x8x32xf32>
    tpu.vector_store %arg7[%c0_60, %c0_61, %c0_62], %101 {strides = array<i32>} : memref<1x8x32xf32, #tpu.memory_space<vmem>>, vector<1x8x32xf32>,
    return
  }
  func.func @transform_0(%arg0: i32, %arg1: i32) -> (i32, i32, i32) {
    %c0_i32 = arith.constant 0 : i32
    %c0_i32_0 = arith.constant 0 : i32
    %c0_i32_1 = arith.constant 0 : i32
    return %arg0, %c0_i32, %c0_i32_0 : i32, i32, i32
  }
  func.func @transform_1(%arg0: i32, %arg1: i32) -> (i32, i32) {
    %c0_i32 = arith.constant 0 : i32
    %c0_i32_0 = arith.constant 0 : i32
    %c0_i32_1 = arith.constant 0 : i32
    return %c0_i32, %c0_i32_0 : i32, i32
  }
  func.func @transform_2(%arg0: i32, %arg1: i32) -> (i32, i32) {
    %c0_i32 = arith.constant 0 : i32
    %c0_i32_0 = arith.constant 0 : i32
    %c0_i32_1 = arith.constant 0 : i32
    return %c0_i32, %c0_i32_0 : i32, i32
  }
  func.func @transform_3(%arg0: i32, %arg1: i32) -> (i32, i32, i32) {
    %c0_i32 = arith.constant 0 : i32
    %c0_i32_0 = arith.constant 0 : i32
    %c0_i32_1 = arith.constant 0 : i32
    %c0_i32_2 = arith.constant 0 : i32
    return %c0_i32, %c0_i32_0, %c0_i32_1 : i32, i32, i32
  }
  func.func @transform_4(%arg0: i32, %arg1: i32) -> (i32, i32) {
    %c0_i32 = arith.constant 0 : i32
    %c0_i32_0 = arith.constant 0 : i32
    %c0_i32_1 = arith.constant 0 : i32
    return %c0_i32, %c0_i32_0 : i32, i32
  }
  func.func @transform_5(%arg0: i32, %arg1: i32) -> (i32, i32, i32) {
    %c0_i32 = arith.constant 0 : i32
    %c0_i32_0 = arith.constant 0 : i32
    return %arg0, %arg1, %c0_i32 : i32, i32, i32
  }
}

</mosaic_0001>

<bundles_post_ra>
// kernel: tpu_custom_call.1
= control target key start
LH: loop header
LB: loop body
LE: loop exit
PB: predicated region body
PF: predicated region fallthrough
CT: control target
= control target key end

     0   :  { %s2232_s0 = inlined_call_operand.hbm [shape: f32[2,8,32], index: 0, kind: input, shape index: {}]   ;;  %s2233_s1 = inlined_call_operand.hbm [shape: f32[32,96], index: 1, kind: input, shape index: {}]   ;;  %s2234_s2 = inlined_call_operand.vmem [shape: f32[1,96], index: 2, kind: input, shape index: {}]   ;;  %s2235_s3 = inlined_call_operand.hbm [shape: f32[4,8,32], index: 3, kind: input, shape index: {}]   ;;  %s2236_s4 = inlined_call_operand.vmem [shape: f32[1,32], index: 4, kind: input, shape index: {}]   ;;  %s2237_s5 = inlined_call_operand.hbm [shape: f32[2,8,32], index: 5, kind: output, shape index: {}]  }
   0x1   :  { %2241 = sst [smem:[#allocation14_spill]] %s2233_s1 }
   0x2   :  { %10 = vsyncpa [#allocation5], 0 }
   0x3   :  { %12 = vsyncpa [#allocation5 + $0x1], 0 }
   0x4   :  { %13 = vsyncpa [#allocation8], 0 }
   0x5   :  { %14 = vsyncpa [#allocation6], 0 }
   0x6   :  { %16 = vsyncpa [#allocation6 + $0x1], 0  ;;  %s1955_s18 = smov 0   ;;  %s1957_s19 = smov 0  }
   0x7   :  { %s1959_s20 = smov 0   ;;  %s1961_s21 = smov 0  }
   0x8   :  { %s1963_s22 = smov 0   ;;  %s1965_s23 = smov 0  }
   0x9 LB: > { %s1490_s24 = sadd.s32 4294967295, %s1904_s23   ;;  %s1491_s25 = sadd.s32 4294967294, %s1904_s23   ;;  %s1904_s23 = sphi %s1965_s23, %s22_s23   ;;  %s1900_s22 = sphi %s1963_s22, %s2259_s22   ;;  %s1896_s21 = sphi %s1961_s21, %s2258_s21   ;;  %s1892_s20 = sphi %s1959_s20, %s2257_s20   ;;  %s1888_s19 = sphi %s1957_s19, %s2256_s19   ;;  %s1884_s18 = sphi %s1955_s18, %s2255_s18  }
   0xa   : > { %p54_p0 = scmp.ne.s32.totalorder %s1888_s19, %s1884_s18  ;;  %p1989_p1 = scmp.eq.s32.totalorder %s1490_s24, 0 }
   0xb   : > { %p1993_p2 = scmp.eq.s32.totalorder %s1490_s24, 1  ;;  %p170_p3 = scmp.eq.s32.totalorder %s1491_s25, 1 }
   0xc   : > { %s2242_s26 = scalar_select %p1989_p1, 1, 0 }
   0xd   : > { %p1999_p4 = por %p1989_p1, %p54_p0  ;;  %p1492_p5 = scmp.ge.s32.totalorder %s1904_s23, 1 }
   0xe   : > { %p2004_p6 = por %p170_p3, %p54_p0  ;;  %p177_p7 = scmp.lt.s32.totalorder %s1904_s23, 3 }
   0xf   : > { %s2244_s28 = scalar_select %p1999_p4, 1, 0 }
  0x10   : > { %s2245_s29 = scalar_select %p2004_p6, 1, 0 }
  0x11   : > { %p2009_p8 = pnand %p1492_p5, %p177_p7  ;;  %s1906_s6 = smov [#allocation7]  }
  0x12   : > { %s189_s7 = sshll.u32 %s1906_s6, 4  ;;  %s1907_s9 = smov [#allocation9]   ;;  %s190_s7 = int_to_ptr.vmem [resolvable:$true] %s189_s7 }
  0x13   : > { %p1638_p9 = pneg %p2009_p8  ;;  %s205_s10 = sshll.u32 %s1907_s9, 4  ;;  %s206_s10 = int_to_ptr.vmem [resolvable:$true] %s205_s10 }
  0x14   : > { %s1751_s11 = scalar_lea.vmem %s190_s7, 512  ;;  %p1759_p5 = scmp.lt.s32.totalorder %s190_s7, %s190_s7 }
  0x15   : > { %p2018_p11 = pnand %p1638_p9, %p1989_p1  ;;  %p1752_p13 = scmp.ne.s32.totalorder %s190_s7, %s1751_s11 }
  0x16   : > { %p1760_p7 = scmp.lt.s32.totalorder %s1751_s11, %s1751_s11 }
  0x17   : > { %p1742_p12 = pneg %p2018_p11 }
  0x18   : > { %p1761_p10 = por %p1760_p7, %p1759_p5 }
  0x19   : > { %p1754_p0 = pnand %p1752_p13, %p1742_p12 }
  0x1b   : > { %p1755_p3 = pneg %p1754_p0 }
  0x1d   : > { %p1762_p9 = pnand %p1761_p10, %p1755_p3 }
  0x1f   : > { %1765 = shalt.err (!%p1762_p9)
}
  0x20   : > { %s1908_s12 = smov 128   ;;  %s1909_s13 = smov 8  }
  0x21   : > { %s2248_s1 = sld [smem:[#allocation14_spill]]  ;;  %s1777_s16 = scalar_lea.vmem %s206_s10, 512 }
  0x22   : > { %p1778_p6 = scmp.ne.s32.totalorder %s206_s10, %s1777_s16  ;;  %p1785_p1 = scmp.lt.s32.totalorder %s206_s10, %s206_s10 }
  0x23   : > { %p1786_p4 = scmp.lt.s32.totalorder %s1777_s16, %s1777_s16 }
  0x24   : > { %p1780_p13 = pnand %p1778_p6, %p1742_p12 }
  0x25   : > { %p1787_p5 = por %p1786_p4, %p1785_p1 }
  0x26   : > { %p1781_p0 = pneg %p1780_p13 }
  0x27   : > { %1641 = dma.hbm_to_vmem [thread:$0]  (!%p2018_p11), %s2248_s1, 512, %s190_s7, [#allocation8], %s1908_s12, %s1908_s12, %s1909_s13  }
  0x28   : > { %p1788_p10 = pnand %p1787_p5, %p1781_p0 }
  0x2a   : > { %1791 = shalt.err (!%p1788_p10)
}
  0x2b   : > { %1644 = dma.hbm_to_vmem [thread:$0]  (!%p2018_p11), %s2235_s3, 512, %s206_s10, [#allocation8], %s1908_s12, %s1908_s12, %s1909_s13  }
  0x2c   : > { %s34_s25 = sadd.s32 1, %s1900_s22  ;;  %s41_s6 = sadd.s32 1, %s1892_s20 }
  0x2d   : > { %p36_p1 = scmp.ge.s32.totalorder %s34_s25, 2  ;;  %p48_p4 = scmp.ne.s32.totalorder %s1892_s20, %s1888_s19 }
  0x2e   : > { %p49_p6 = scmp.eq.s32.totalorder %s1904_s23, 0  ;;  %p1655_p12 = scmp.lt.s32.totalorder %s1904_s23, 2 }
  0x2f   : > { %s2261_s25 = smov (%p36_p1, %s34_s25), 0  ;;  %p2050_p7 = por %p1993_p2, %p48_p4 }
  0x30   : > { %p50_p3 = por %p49_p6, %p48_p4  ;;  %s38_s8 = ssub.s32 %s1900_s22, %s2261_s25 }
  0x31   : > { %s222_s9 = sand.u32 1, %s1892_s20   ;;  %p39_p9 = scmp.eq.s32.totalorder %s38_s8, 0 }
  0x32   : > { %s1496_s10 = sshll.u32 %s222_s9, 3  ;;  %s1497_s11 = sshll.u32 %s1900_s22, 7 }
  0x33   : > { %s2059_s12 = scalar_select %p39_p9, %s1892_s20, %s41_s6  }
  0x34   : > { %s231_s15 = scalar_lea.hbm %s2232_s0, %s1497_s11  ;;  %s226_s16 = scalar_lea.vmem [#allocation4], %s1496_s10 }
  0x35   : > { %s233_s17 = sshll.u32 %s226_s16, 4  ;;  %p2066_p11 = pnand %p1655_p12, %p50_p3  ;;  %s234_s17 = int_to_ptr.vmem [resolvable:$true] %s233_s17 }
  0x36   : > { %s223_s24 = scalar_lea.sflag [#allocation5], %s222_s9  ;;  %s1805_s8 = scalar_lea.vmem %s234_s17, 128 }
  0x37   : > { %p1794_p2 = pneg %p2066_p11  ;;  %p1806_p13 = scmp.ne.s32.totalorder %s234_s17, %s1805_s8 }
  0x38   : > { %s1910_s6 = smov [#allocation4]  }
  0x39   : > { %p1808_p0 = pnand %p1806_p13, %p1794_p2  ;;  %s1810_s1 = sshll.u32 %s1910_s6, 4  ;;  %s1811_s1 = int_to_ptr.vmem [resolvable:$false] %s1810_s1 }
  0x3a   : > { %s1812_s11 = scalar_lea.vmem %s1811_s1, 256  ;;  %p1813_p10 = scmp.lt.s32.totalorder %s234_s17, %s1811_s1 }
  0x3b   : > { %p1809_p5 = pneg %p1808_p0  ;;  %p1814_p1 = scmp.lt.s32.totalorder %s1812_s11, %s1805_s8 }
  0x3d   : > { %p1815_p4 = por %p1814_p1, %p1813_p10 }
  0x3f   : > { %p1816_p6 = pnand %p1815_p4, %p1809_p5 }
  0x41   : > { %1819 = shalt.err (!%p1816_p6)
}
  0x42   : > { %1648 = dma.hbm_to_vmem [thread:$0]  (!%p2066_p11), %s231_s15, 128, %s234_s17, %s223_s24  }
  0x43   : > { %242 = sbr.rel (%p2009_p8) target bundleno = 2230 (0x8b6), region = 40  ;;  %s2077_s9 = sand.u32 (!%p2009_p8), 1, %s1888_s19  }
  0x44   : > { %s1499_s10 = sshll.u32 (!%p2009_p8), %s2077_s9, 3  ;;  %s245_s13 = scalar_lea.sflag (!%p2009_p8), [#allocation5], %s2077_s9 }
  0x45   : > { %s248_s1 = scalar_lea.vmem (!%p2009_p8), [#allocation4], %s1499_s10  ;;  %p2251_p12 = scmp.ne.s32.totalorder (!%p2009_p8), %s2244_s28, 0 }
  0x48   : > { %1871 = dma.done.wait (%p2251_p12), %s245_s13, 128  }
  0x49   : > { %1873 = vsyncadd (%p2251_p12), %s245_s13, 4294967168  ;;  %p2252_p3 = scmp.ne.s32.totalorder %s2242_s26, 0 }
  0x4b   : > { %1875 = dma.done.wait (%p2252_p3), [#allocation8], 1024  }
  0x4c   : > { %1877 = vsyncadd (%p2252_p3), [#allocation8], 4294966272  ;;  %v1911_v0 = vmov 0.0   ;;  %vm1912_vm0 = vmmov 0   ;;  %v291_v1 = vld [vmem:[#allocation7 + $0x18] sm:$0xff]  ;;  %v290_v2 = vld [vmem:[#allocation7 + $0x10] sm:$0xff] }
  0x4d   : > { %1555 = vmatprep.subr.mxu0 %v1911_v0  ;;  %1563 = vmatprep.mubr.msk.f32.mxu0 %vm1912_vm0, %v1911_v0  ;;  %v289_v3 = vld [vmem:[#allocation7 + $0x8] sm:$0xff]  ;;  %v288_v4 = vld [vmem:[#allocation7] sm:$0xff]  ;;  %v287_v5 = vld [vmem:[%s248_s1] sm:$0xff]  ;;  %vm299_vm1 = vcmask 261120   ;;  %vm373_vm2 = vcmask 785408   ;;  %s1913_s30 = smov 64  }
  0x4e   : > { %1566 = vmatprep.subr.mxu1 %v1911_v0  ;;  %1568 = vmatprep.mubr.msk.f32.mxu1 %vm1912_vm0, %v1911_v0  ;;  %v1503_v6 = vld [vmem:[%s2234_s2] ss:$0 sm:$0xff]  ;;  %s1914_s14 = smov 96   ;;  %s1915_s15 = smov 88   ;;  %vm392_vm3 = vcmask 64512   ;;  %v803_v45 = vld [vmem:[#allocation9 + $0x8] sm:$0xff] }
  0x4f   : > { %1556 = vmatpush3.msra.mxu0 %v291_v1  ;;  %s1916_s16 = smov 120   ;;  %s1917_s17 = smov 80   ;;  %v556_v23 = vld [vmem:[#allocation9] sm:$0xff] }
  0x50   : > { %1557 = vmatprep.subr.mxu0 %v1911_v0  ;;  %s1918_s27 = smov 56   ;;  %s1919_s24 = smov 112   ;;  %v1505_v32 = vld [vmem:[%s2236_s4] ss:$0 sm:$0xff] }
  0x51   : > { %1558 = vmatpush3.msra.mxu0 %v290_v2  ;;  %385 = vst.msk [vmem:[#allocation3] sm:$0xff] %vm299_vm1, %v1505_v32  ;;  %s1920_s11 = smov 48   ;;  %s1921_s13 = smov 104  }
  0x52   : > { %1559 = vmatprep.subr.mxu0 %v1911_v0  ;;  %s1922_s1 = smov 72   ;;  %s1923_s26 = smov 40  }
  0x53   : > { %1560 = vmatpush3.msra.mxu0 %v289_v3  ;;  %v1050_v3 = vld [vmem:[#allocation9 + $0x10] sm:$0xff]  ;;  %s1523_s28 = sshll.u32 %s1896_s21, 7  ;;  %s1924_s8 = smov [#allocation10]  }
  0x54   : > { %1561 = vmatprep.subr.mxu0 %v1911_v0  ;;  %s1824_s21 = sshll.u32 %s1924_s8, 4  ;;  %s1825_s21 = int_to_ptr.vmem [resolvable:$false] %s1824_s21 }
  0x55   : > { %1562 = vmatpush3.msra.mxu0 %v288_v4 }
  0x56   : > { %1564 = vmatmul.mubr.msk.f32.vlgmr.msra.gmra.mxu0 %vm299_vm1, %v287_v5  ;;  %1576 = vmatprep.subr.mxu0 %v1911_v0 }
  0x57   : > { %1578 = vmatprep.mubr.msk.f32.mxu0 %vm1912_vm0, %v1911_v0  ;;  %1577 = vmatpush3.msra.mxu0 %v556_v23 }
  0x58   : > { %1586 = vmatprep.subr.mxu0 %v1911_v0  ;;  %v555_v41 = vld [vmem:[#allocation3] sm:$0xff] }
 0x116   : > { %v369_v7 = vpop.f32.mrf.mxu0 }
 0x117   : > { %v370_v8 = vadd.f32 %v1503_v6, %v369_v7 }
 0x118   : > { %v1565_v9 = vpop.f32.mrf.mxu0 }
 0x119   : > { %374 = vst.msk [vmem:[#allocation2] sm:$0xff] %vm373_vm2, %v370_v8 }
 0x120   : > { %v2107_v10 = vld [vmem:[#allocation2] sm:$0xff] }
 0x121   : > { %477 = vrot.lane.b32.xlu1 %v2107_v10, %s1913_s30  ;;  %390 = vrot.lane.b32.xlu0 %v2107_v10, %s1914_s14  ;;  %s282_s30 = scalar_lea.vmem [#allocation10], %s1499_s10  ;;  %s1826_s10 = scalar_lea.vmem %s1825_s21, 256 }
 0x122   : > { %s1390_s14 = sshll.u32 %s282_s30, 4  ;;  %s1391_s14 = int_to_ptr.vmem [resolvable:$true] %s1390_s14 }
 0x123   : > { %p1827_p2 = scmp.lt.s32.totalorder %s1391_s14, %s1825_s21 }
 0x125   : > { %638 = vrot.lane.b32.xlu1 %v2107_v10, %s1915_s15 }
 0x129   : > { %635 = vrot.lane.b32.xlu1 %v2107_v10, %s1916_s16 }
 0x193   : > { %v391_v11 = vpop.permute.xlu0 %390  ;;  %v478_v12 = vpop.permute.xlu1 %477 }
 0x194   : > { %1567 = vmatpush3.xpose.msk.msra.mxu1 %vm392_vm3, %v391_v11 }
 0x195   : > { %1571 = vmatprep.subr.mxu1 %v1911_v0 }
 0x197   : > { %1569 = vmatmul.mubr.msk.f32.vlgmr.msra.gmra.mxu1 %vm392_vm3, %v2107_v10  ;;  %v639_v19 = vpop.permute.xlu1 %638 }
 0x198   : > { %1572 = vmatpush3.msra.mxu1 %v478_v12  ;;  %1573 = vmatprep.mubr.msk.f32.mxu1 %vm1912_vm0, %v1911_v0 }
 0x199   : > { %1581 = vmatprep.subr.mxu1 %v1911_v0 }
 0x19b   : > { %v636_v22 = vpop.permute.xlu1 %635 }
 0x257   : > { %v464_v13 = vpop.f32.mrf.mxu1 }
 0x258   : > { %v468_v14 = vsel %vm392_vm3, %v464_v13, -inf }
 0x259   : > { %469 = vmax.xlane.f32.xlu0 %v468_v14  ;;  %v1570_v15 = vpop.f32.mrf.mxu1 }
 0x2e2   : > { %v470_v16 = vpop.xlane.xlu0 %469 }
 0x2e3   : > { %v471_v17 = vsub.f32 %v464_v13, %v470_v16 }
 0x2e5   : > { %v472_v18 = vmul.f32 1.442695, %v471_v17 }
 0x2e7   : > { %1724 = vpow2.f32 %v472_v18 }
 0x2f4   : > { %v1725_v20 = vpop.eup %1724 }
 0x2f5   : > { %1574 = vmatmul.mubr.msk.f32.vlgmr.msra.gmra.mxu1 %vm392_vm3, %v1725_v20  ;;  %v474_v21 = vsel %vm392_vm3, %v1725_v20, 0.0 }
 0x2f6   : > { %1582 = vmatpush3.xpose.msk.msra.mxu1 %vm392_vm3, %v639_v19  ;;  %475 = vadd.xlane.f32.xlu1 %v474_v21 }
 0x2f7   : > { %1583 = vmatprep.mubr.msk.f32.mxu1 %vm1912_vm0, %v1911_v0  ;;  %1591 = vmatprep.subr.mxu1 %v1911_v0 }
 0x2f9   : > { %1584 = vmatmul.mubr.msk.f32.vlgmr.msra.gmra.mxu1 %vm392_vm3, %v636_v22 }
 0x2fa   : > { %1593 = vmatprep.mubr.msk.f32.mxu1 %vm1912_vm0, %v1911_v0  ;;  %1592 = vmatpush3.msra.mxu1 %v803_v45 }
 0x2fb   : > { %1601 = vmatprep.subr.mxu1 %v1911_v0 }
 0x307   : > { %885 = vrot.lane.b32.xlu1 %v2107_v10, %s1917_s17  ;;  %s2189_s17 = scalar_lea.hbm %s2237_s5, %s1523_s28 }
 0x37f   : > { %v476_v24 = vpop.xlane.xlu1 %475 }
 0x380   : > { %1726 = vrcp.f32 %v476_v24 }
 0x383   : > { %v886_v38 = vpop.permute.xlu1 %885 }
 0x38d   : > { %v1727_v25 = vpop.eup %1726 }
 0x3b5   : > { %v549_v26 = vpop.f32.mrf.mxu1 }
 0x3b6   : > { %v554_v27 = vmul.f32 %v1727_v25, %v549_v26 }
 0x3b7   : > { %v1575_v28 = vpop.f32.mrf.mxu1 }
 0x3b8   : > { %1579 = vmatmul.mubr.msk.f32.vlgmr.msra.gmra.mxu0 %vm392_vm3, %v554_v27 }
 0x3b9   : > { %v710_v29 = vpop.f32.mrf.mxu1  ;;  %1588 = vmatprep.mubr.msk.f32.mxu0 %vm1912_vm0, %v1911_v0 }
 0x3ba   : > { %v714_v30 = vsel %vm392_vm3, %v710_v29, -inf }
 0x3bb   : > { %715 = vmax.xlane.f32.xlu0 %v714_v30  ;;  %v1585_v31 = vpop.f32.mrf.mxu1 }
 0x3d1   : > { %723 = vrot.lane.b32.xlu0 %v2107_v10, %s1918_s27  ;;  %s1376_s27 = scalar_lea.sflag [#allocation6], %s2077_s9 }
 0x3d5   : > { %882 = vrot.lane.b32.xlu0 %v2107_v10, %s1919_s24  ;;  %s1820_s24 = scalar_lea.vmem %s1391_s14, 128 }
 0x3d6   : > { %p1821_p8 = scmp.ne.s32.totalorder %s1391_s14, %s1820_s24  ;;  %p1828_p13 = scmp.lt.s32.totalorder %s1826_s10, %s1820_s24 }
 0x3d8   : > { %p1822_p9 = pnand %p1821_p8, %p2050_p7  ;;  %p1829_p0 = por %p1828_p13, %p1827_p2 }
 0x3da   : > { %p1823_p11 = pneg %p1822_p9 }
 0x3dc   : > { %p1830_p5 = pnand %p1829_p0, %p1823_p11 }
 0x444   : > { %v716_v33 = vpop.xlane.xlu0 %715 }
 0x445   : > { %v717_v34 = vsub.f32 %v710_v29, %v716_v33 }
 0x447   : > { %v718_v35 = vmul.f32 1.442695, %v717_v34 }
 0x448   : > { %v724_v36 = vpop.permute.xlu0 %723 }
 0x449   : > { %1728 = vpow2.f32 %v718_v35  ;;  %1587 = vmatpush3.msra.mxu0 %v724_v36 }
 0x44a   : > { %1596 = vmatprep.subr.mxu0 %v1911_v0 }
 0x44c   : > { %v883_v40 = vpop.permute.xlu0 %882 }
 0x456   : > { %v1729_v37 = vpop.eup %1728 }
 0x457   : > { %1589 = vmatmul.mubr.msk.f32.vlgmr.msra.gmra.mxu0 %vm392_vm3, %v1729_v37  ;;  %v720_v39 = vsel %vm392_vm3, %v1729_v37, 0.0 }
 0x458   : > { %1597 = vmatpush3.xpose.msk.msra.mxu0 %vm392_vm3, %v886_v38  ;;  %721 = vadd.xlane.f32.xlu0 %v720_v39 }
 0x459   : > { %1598 = vmatprep.mubr.msk.f32.mxu0 %vm1912_vm0, %v1911_v0  ;;  %1606 = vmatprep.subr.mxu0 %v1911_v0 }
 0x45b   : > { %1599 = vmatmul.mubr.msk.f32.vlgmr.msra.gmra.mxu0 %vm392_vm3, %v883_v40 }
 0x45c   : > { %1608 = vmatprep.mubr.msk.f32.mxu0 %vm1912_vm0, %v1911_v0  ;;  %1607 = vmatpush3.msra.mxu0 %v1050_v3 }
 0x45d   : > { %1616 = vmatprep.subr.mxu0 %v1911_v0 }
 0x46e   : > { %970 = vrot.lane.b32.xlu0 %v2107_v10, %s1920_s11 }
 0x472   : > { %1129 = vrot.lane.b32.xlu0 %v2107_v10, %s1921_s13 }
 0x478   : > { %v626_v42 = vpop.f32.mrf.mxu0 }
 0x479   : > { %v630_v43 = vadd.f32 %v626_v42, %v555_v41 }
 0x47a   : > { %v1580_v44 = vpop.f32.mrf.mxu0 }
 0x47b   : > { %631 = vst.msk [vmem:[#allocation3] sm:$0xff] %vm299_vm1, %v630_v43 }
 0x482   : > { %v801_v62 = vld [vmem:[#allocation3] sm:$0xff] }
 0x4e1   : > { %v722_v46 = vpop.xlane.xlu0 %721 }
 0x4e2   : > { %1730 = vrcp.f32 %v722_v46 }
 0x4e5   : > { %v971_v51 = vpop.permute.xlu0 %970 }
 0x4e9   : > { %v1130_v61 = vpop.permute.xlu0 %1129 }
 0x4ef   : > { %v1731_v47 = vpop.eup %1730 }
 0x517   : > { %v795_v48 = vpop.f32.mrf.mxu0 }
 0x518   : > { %v800_v49 = vmul.f32 %v1731_v47, %v795_v48 }
 0x519   : > { %v1590_v50 = vpop.f32.mrf.mxu0 }
 0x51a   : > { %1594 = vmatmul.mubr.msk.f32.vlgmr.msra.gmra.mxu1 %vm392_vm3, %v800_v49 }
 0x51b   : > { %1602 = vmatpush3.msra.mxu1 %v971_v51  ;;  %v957_v52 = vpop.f32.mrf.mxu0  ;;  %1603 = vmatprep.mubr.msk.f32.mxu1 %vm1912_vm0, %v1911_v0 }
 0x51c   : > { %v961_v53 = vsel %vm392_vm3, %v957_v52, -inf  ;;  %1611 = vmatprep.subr.mxu1 %v1911_v0 }
 0x51d   : > { %962 = vmax.xlane.f32.xlu1 %v961_v53  ;;  %v1600_v54 = vpop.f32.mrf.mxu0 }
 0x52e   : > { %1132 = vrot.lane.b32.xlu1 %v2107_v10, %s1922_s1 }
 0x5a6   : > { %v963_v55 = vpop.xlane.xlu1 %962 }
 0x5a7   : > { %v964_v56 = vsub.f32 %v957_v52, %v963_v55 }
 0x5a9   : > { %v965_v57 = vmul.f32 1.442695, %v964_v56 }
 0x5aa   : > { %v1133_v59 = vpop.permute.xlu1 %1132 }
 0x5ab   : > { %1732 = vpow2.f32 %v965_v57 }
 0x5b8   : > { %v1733_v58 = vpop.eup %1732 }
 0x5b9   : > { %1604 = vmatmul.mubr.msk.f32.vlgmr.msra.gmra.mxu1 %vm392_vm3, %v1733_v58  ;;  %v967_v60 = vsel %vm392_vm3, %v1733_v58, 0.0 }
 0x5ba   : > { %1612 = vmatpush3.xpose.msk.msra.mxu1 %vm392_vm3, %v1133_v59  ;;  %968 = vadd.xlane.f32.xlu1 %v967_v60 }
 0x5bb   : > { %1613 = vmatprep.mubr.msk.f32.mxu1 %vm1912_vm0, %v1911_v0  ;;  %1621 = vmatprep.subr.mxu1 %v1911_v0 }
 0x5bd   : > { %1614 = vmatmul.mubr.msk.f32.vlgmr.msra.gmra.mxu1 %vm392_vm3, %v1130_v61 }
 0x5be   : > { %1623 = vmatprep.mubr.msk.f32.mxu1 %vm1912_vm0, %v1911_v0 }
 0x5da   : > { %v873_v63 = vpop.f32.mrf.mxu1 }
 0x5db   : > { %v877_v1 = vadd.f32 %v873_v63, %v801_v62 }
 0x5dc   : > { %v1595_v2 = vpop.f32.mrf.mxu1 }
 0x5dd   : > { %878 = vst.msk [vmem:[#allocation3] sm:$0xff] %vm299_vm1, %v877_v1 }
 0x5e4   : > { %v1048_v19 = vld [vmem:[#allocation3] sm:$0xff] }
 0x643   : > { %v969_v4 = vpop.xlane.xlu1 %968 }
 0x644   : > { %1734 = vrcp.f32 %v969_v4 }
 0x651   : > { %v1735_v5 = vpop.eup %1734 }
 0x679   : > { %v1042_v6 = vpop.f32.mrf.mxu1 }
 0x67a   : > { %v1047_v7 = vmul.f32 %v1735_v5, %v1042_v6 }
 0x67b   : > { %v1605_v8 = vpop.f32.mrf.mxu1 }
 0x67c   : > { %1609 = vmatmul.mubr.msk.f32.vlgmr.msra.gmra.mxu0 %vm392_vm3, %v1047_v7 }
 0x67d   : > { %v1204_v9 = vpop.f32.mrf.mxu1  ;;  %1618 = vmatprep.mubr.msk.f32.mxu0 %vm1912_vm0, %v1911_v0  ;;  %v1297_v0 = vld [vmem:[#allocation9 + $0x18] sm:$0xff] }
 0x67e   : > { %v1208_v11 = vsel %vm392_vm3, %v1204_v9, -inf  ;;  %1622 = vmatpush3.msra.mxu1 %v1297_v0 }
 0x67f   : > { %1209 = vmax.xlane.f32.xlu0 %v1208_v11  ;;  %v1615_v12 = vpop.f32.mrf.mxu1 }
 0x695   : > { %1217 = vrot.lane.b32.xlu0 %v2107_v10, %s1923_s26 }
 0x708   : > { %v1210_v13 = vpop.xlane.xlu0 %1209 }
 0x709   : > { %v1211_v14 = vsub.f32 %v1204_v9, %v1210_v13 }
 0x70b   : > { %v1212_v15 = vmul.f32 1.442695, %v1211_v14 }
 0x70c   : > { %v1218_v16 = vpop.permute.xlu0 %1217 }
 0x70d   : > { %1736 = vpow2.f32 %v1212_v15  ;;  %1617 = vmatpush3.msra.mxu0 %v1218_v16 }
 0x71a   : > { %v1737_v17 = vpop.eup %1736 }
 0x71b   : > { %1619 = vmatmul.mubr.msk.f32.vlgmr.msra.gmra.mxu0 %vm392_vm3, %v1737_v17  ;;  %v1214_v18 = vsel %vm392_vm3, %v1737_v17, 0.0 }
 0x71c   : > { %1215 = vadd.xlane.f32.xlu1 %v1214_v18 }
 0x73c   : > { %v1120_v20 = vpop.f32.mrf.mxu0 }
 0x73d   : > { %v1124_v21 = vadd.f32 %v1120_v20, %v1048_v19 }
 0x73e   : > { %v1610_v10 = vpop.f32.mrf.mxu0 }
 0x73f   : > { %1125 = vst.msk [vmem:[#allocation3] sm:$0xff] %vm299_vm1, %v1124_v21 }
 0x746   : > { %v1295_v27 = vld [vmem:[#allocation3] sm:$0xff] }
 0x7a5   : > { %v1216_v22 = vpop.xlane.xlu1 %1215 }
 0x7a6   : > { %1738 = vrcp.f32 %v1216_v22 }
 0x7b3   : > { %v1739_v23 = vpop.eup %1738 }
 0x7db   : > { %v1289_v24 = vpop.f32.mrf.mxu0 }
 0x7dc   : > { %v1294_v25 = vmul.f32 %v1739_v23, %v1289_v24 }
 0x7dd   : > { %v1620_v26 = vpop.f32.mrf.mxu0 }
 0x7de   : > { %1624 = vmatmul.mubr.msk.f32.vlgmr.msra.gmra.mxu1 %vm392_vm3, %v1294_v25 }
 0x89e   : > { %v1367_v28 = vpop.f32.mrf.mxu1 }
 0x89f   : > { %v1371_v29 = vadd.f32 %v1367_v28, %v1295_v27 }
 0x8a0   : > { %v1625_v30 = vpop.f32.mrf.mxu1 }
 0x8a1   : > { %1372 = vst.msk [vmem:[#allocation3] sm:$0xff] %vm299_vm1, %v1371_v29 }
 0x8a8   : > { %v1373_v31 = vld [vmem:[#allocation3] sm:$0xff] }
 0x8a9   : > { %1374 = vst.msk [vmem:[%s282_s30] sm:$0xff] %vm299_vm1, %v1373_v31 }
 0x8aa   : > { %1833 = shalt.err (!%p1830_p5)
}
 0x8ab   : > { %s1834_s6 = scalar_lea.hbm %s2189_s17, 128  ;;  %s1838_s13 = scalar_lea.hbm %s2237_s5, 256 }
 0x8ac   : > { %p1835_p10 = scmp.ne.s32.totalorder %s2189_s17, %s1834_s6  ;;  %p1839_p6 = scmp.lt.s32.totalorder %s2189_s17, %s2237_s5 }
 0x8ad   : > { %p1840_p12 = scmp.lt.s32.totalorder %s1838_s13, %s1834_s6 }
 0x8ae   : > { %p1836_p1 = pnand %p1835_p10, %p2050_p7 }
 0x8af   : > { %p1841_p3 = por %p1840_p12, %p1839_p6 }
 0x8b0   : > { %p1837_p4 = pneg %p1836_p1 }
 0x8b2   : > { %p1842_p8 = pnand %p1841_p3, %p1837_p4 }
 0x8b4   : > { %1845 = shalt.err (!%p1842_p8)
}
 0x8b5   : > { %1636 = dma.vmem_to_hbm [thread:$0]  (%p2050_p7), %s1391_s14, 128, %s2189_s17, %s1376_s27  }
 0x8b6 PF: > { %s1402_s28 = sand.u32 1, %s1884_s18   ;;  %p2253_p9 = scmp.ne.s32.totalorder %s2245_s29, 0 }
 0x8b7   : > { %p2254_p11 = scmp.ge.s32.totalorder %s1904_s23, 2  ;;  %s1403_s30 = scalar_lea.sflag [#allocation6], %s1402_s28 }
 0x8b9   : > { %p1650_p2 = pnand %p2254_p11, %p2253_p9 }
 0x8bb   : > { %p1651_p13 = pneg %p1650_p2 }
 0x8bd   : > { %1879 = dma.done.wait (%p1651_p13), %s1403_s30, 128  }
 0x8be   : > { %1881 = vsyncadd (%p1651_p13), %s1403_s30, 4294967168  ;;  %s22_s23 = sadd.s32 1, %s1904_s23   ;;  %s2255_s18 = smov %s1888_s19 }
 0x8bf   : > { %p19_p0 = scmp.ge.s32.totalorder %s22_s23, 4   ;;  %s2256_s19 = smov %s1892_s20 }
 0x8c0   : > { %s2257_s20 = smov %s2059_s12  ;;  %s2258_s21 = smov %s1900_s22 }
 0x8c1   : > { %s2259_s22 = smov %s2261_s25  ;;  %21 = sbr.rel (!%p19_p0) target bundleno = 9 (0x9), region = 101 }
 0x8c6   :  { %1408 = vsyncpa [#allocation5], 1 }
 0x8c7   :  { %1410 = vsyncpa [#allocation5 + $0x1], 1 }
 0x8c8   :  { %1411 = vsyncpa [#allocation8], 1 }
 0x8c9   :  { %1412 = vsyncpa [#allocation6], 1 }
 0x8ca   :  { %1414 = vsyncpa [#allocation6 + $0x1], 1 }

</bundles_post_ra>
